<compile_context>
chip_gen: v7x
topology: tpu7x:2x2x1
jax: 0.10.0
libtpu: 0.0.40
codegen_flags: <defaults>
</compile_context>

<pallas_src>
import functools

import jax
import jax.numpy as jnp
from jax.experimental import pallas as pl
from jax.experimental.pallas import tpu as pltpu

_LANE = 128
_SUBLANE = 8


def _round_up(n, m):
    return ((n + m - 1) // m) * m


def _apply_act(y, act):
    if act == "ReLU":
        return jnp.maximum(y, 0.0)
    if act == "sigmoid":
        return jax.nn.sigmoid(y)
    if act == "tanh":
        return jnp.tanh(y)
    if act == "leakyReLU":
        return jnp.where(y >= 0.0, y, 0.01 * y)  # nn.LeakyReLU default slope 0.01
    if act == "identity" or act is None:
        return y
    raise ValueError(f"unknown activation {act!r}")


# --------------------------------------------------------------------------
# Pallas kernel: the whole MLP for one batch tile.
#   refs = (X, W0, b0, W1, b1, ..., out)
# --------------------------------------------------------------------------
def _fused_mlp_kernel(*refs, acts):
    x_ref, o_ref = refs[0], refs[-1]
    wb = refs[1:-1]

    h = x_ref[...]
    for li in range(len(wb) // 2):
        w_ref, b_ref = wb[2 * li], wb[2 * li + 1]
        h = jnp.dot(h, w_ref[...], preferred_element_type=jnp.float32) + b_ref[...]
        h = _apply_act(h, acts[li])

    o_ref[...] = h.astype(o_ref.dtype)


# --------------------------------------------------------------------------
# Wrapper: concat, tile selection, BlockSpecs.
# --------------------------------------------------------------------------
def fused_mlp_forward(x, t, padded_params, acts, out_dim, *, max_tile=2048):
    """padded_params: list of (W_pad, b_pad); feature (lane) dims already padded to 128."""
    B = x.shape[0]
    X = jnp.concatenate([x, t], axis=1)  # tiny (B x ~8); lives inside the surrounding jit
    din = X.shape[1]

    if B <= max_tile:
        # Single grid step: block shapes equal the full arrays, so the (8,128) rule is
        # satisfied with NO batch padding and zero per-step pipeline overhead.
        tb = B
        b_pad = B
        n_tiles = 1
    else:
        # Balanced tiles, each a sublane (8) multiple; padding waste < 8 rows per tile.
        # On v7x, large batches naturally give grid >= 2 so both TensorCores are used.
        n_tiles = pl.cdiv(B, max_tile)
        tb = _round_up(pl.cdiv(B, n_tiles), _SUBLANE)
        b_pad = tb * n_tiles
        if b_pad != B:
            X = jnp.pad(X, ((0, b_pad - B), (0, 0)))

    d_out_pad = padded_params[-1][0].shape[1]  # multiple of 128 -> lane-dense stores

    inputs = [X]
    in_specs = [pl.BlockSpec((tb, din), lambda i: (i, 0))]  # batch-tiled
    for w, b in padded_params:
        inputs += [w, b]
        # Constant index_map -> weights/biases resident in VMEM across grid steps.
        in_specs += [
            pl.BlockSpec(w.shape, lambda i: (0, 0)),
            pl.BlockSpec(b.shape, lambda i: (0, 0)),
        ]

    kernel = functools.partial(_fused_mlp_kernel, acts=tuple(acts))

    y = pl.pallas_call(
        kernel,
        out_shape=jax.ShapeDtypeStruct((b_pad, d_out_pad), jnp.float32),
        grid=(n_tiles,),
        in_specs=in_specs,
        out_specs=pl.BlockSpec((tb, d_out_pad), lambda i: (i, 0)),
        compiler_params=pltpu.CompilerParams(
            dimension_semantics=("parallel",),  # batch axis -> megacore sharding when tiled
        ),
    )(*inputs)

    if b_pad != B:
        y = y[:B]
    return y[:, :out_dim]


# --------------------------------------------------------------------------
# NeuralNetwork equivalent (forward: concat(x, t) -> MLP).
# Weights stored pre-padded: output (lane) dims -> multiple of 128; hidden input dims
# (layers after the first) -> multiple of 128 with zero rows, so padding is inert.
# --------------------------------------------------------------------------
class NeuralNetwork:
    def __init__(self, layers, activations, init, key):
        self.layers = list(layers)
        self.acts = [
            activations[i] if i < len(activations) else None
            for i in range(len(layers) - 1)
        ]
        self.out_dim = layers[-1]
        self.params = []  # list of (W_pad, b_pad)
        for i in range(len(layers) - 1):
            fan_in, fan_out = layers[i], layers[i + 1]
            key, wk, bk = jax.random.split(key, 3)
            if init == "xavier" or init is None:
                std = (2.0 / (fan_in + fan_out)) ** 0.5          # xavier_normal_
            elif init == "he":
                std = (2.0 / fan_in) ** 0.5                      # kaiming_normal_
            else:
                raise ValueError(f"{init} is not a valid initialization")
            W = std * jax.random.normal(wk, (fan_in, fan_out), dtype=jnp.float32)
            bound = 1.0 / (fan_in ** 0.5)                        # PyTorch Linear bias default
            b = jax.random.uniform(
                bk, (1, fan_out), minval=-bound, maxval=bound, dtype=jnp.float32
            )
            fan_out_pad = _round_up(fan_out, _LANE)
            fan_in_pad = fan_in if i == 0 else _round_up(fan_in, _LANE)
            Wp = (
                jnp.zeros((fan_in_pad, fan_out_pad), jnp.float32)
                .at[:fan_in, :fan_out]
                .set(W)
            )
            bp = jnp.zeros((1, fan_out_pad), jnp.float32).at[:, :fan_out].set(b)
            self.params.append((Wp, bp))

        # jit the wrapper so the tiny concat / final slice are dispatched together
        # with the fused Pallas kernel instead of as separate host-dispatched ops.
        self._fwd = jax.jit(
            functools.partial(
                fused_mlp_forward, acts=tuple(self.acts), out_dim=self.out_dim
            )
        )

    def forward(self, x, t):
        return self._fwd(x, t, self.params)


# --------------------------------------------------------------------------
if __name__ == "__main__":
    key = jax.random.PRNGKey(0)
    key, xk, tk, mk = jax.random.split(key, 4)

    # PINN-style setup: x has 6 spatial features, t has 2 -> input dim 8.
    batch = 8
    layers = [8, 32, 32, 4]
    activations = ["tanh", "ReLU"]

    x = jax.random.normal(xk, (batch, 6), dtype=jnp.float32)
    t = jax.random.normal(tk, (batch, 2), dtype=jnp.float32)

    model = NeuralNetwork(layers, activations, init="xavier", key=mk)
    logits = model.forward(x, t)
    jax.block_until_ready(logits)
    assert logits.shape == (batch, layers[-1])

    # Plain-JAX reference using the true (unpadded) weight blocks.
    def reference(mdl, lay, xx, tt):
        ref = jnp.concatenate([xx, tt], axis=1)
        for i, (Wp, bp) in enumerate(mdl.params):
            din, dout = lay[i], lay[i + 1]
            ref = ref @ Wp[:din, :dout] + bp[:, :dout]
            ref = _apply_act(ref, mdl.acts[i])
        return ref

    assert jnp.allclose(logits, reference(model, layers, x, t), atol=1e-4, rtol=1e-4)

    # B=300: single-tile path, no batch padding (300 worked rows, not 512).
    key, xk2, tk2 = jax.random.split(key, 3)
    B2 = 300
    x2 = jax.random.normal(xk2, (B2, 6), dtype=jnp.float32)
    t2 = jax.random.normal(tk2, (B2, 2), dtype=jnp.float32)
    logits2 = model.forward(x2, t2)
    jax.block_until_ready(logits2)
    assert logits2.shape == (B2, layers[-1])
    ref2 = reference(model, layers, x2, t2)
    assert jnp.allclose(logits2, ref2, atol=1e-4, rtol=1e-4)

    # Exercise the multi-tile path explicitly (balanced 8-aligned tiles, minimal padding).
    logits2_tiled = fused_mlp_forward(
        x2, t2, model.params, model.acts, model.out_dim, max_tile=128
    )
    jax.block_until_ready(logits2_tiled)
    assert jnp.allclose(logits2_tiled, ref2, atol=1e-4, rtol=1e-4)

    # Exercise the remaining activation branches + 'he' init.
    key, xk3, tk3, mk3 = jax.random.split(key, 4)
    model3 = NeuralNetwork(layers, ["sigmoid", "leakyReLU"], init="he", key=mk3)
    x3 = jax.random.normal(xk3, (batch, 6), dtype=jnp.float32)
    t3 = jax.random.normal(tk3, (batch, 2), dtype=jnp.float32)
    logits3 = model3.forward(x3, t3)
    jax.block_until_ready(logits3)
    assert jnp.allclose(logits3, reference(model3, layers, x3, t3), atol=1e-4, rtol=1e-4)

    print("KERNEL_OK")
</pallas_src>

<mosaic_0001>
module attributes {stable_mosaic.version = 11 : i64} {
  func.func @_fused_mlp_kernel(%arg0: i32, %arg1: memref<8x8xf32, #tpu.memory_space<vmem>>, %arg2: memref<8x128xf32, #tpu.memory_space<vmem>>, %arg3: memref<1x128xf32, #tpu.memory_space<vmem>>, %arg4: memref<128x128xf32, #tpu.memory_space<vmem>>, %arg5: memref<1x128xf32, #tpu.memory_space<vmem>>, %arg6: memref<128x128xf32, #tpu.memory_space<vmem>>, %arg7: memref<1x128xf32, #tpu.memory_space<vmem>>, %arg8: memref<8x128xf32, #tpu.memory_space<vmem>>) attributes {dimension_semantics = [#tpu.dimension_semantics<parallel>], iteration_bounds = array<i64: 1>, scalar_prefetch = 0 : i64, scratch_operands = 0 : i64, tpu.core_type = #tpu.core_type<tc>, window_params = [{transform_indices = @transform_0, window_bounds = array<i64: 8, 8>}, {pipeline_mode = #tpu.pipeline_mode<synchronous>, transform_indices = @transform_1, window_bounds = array<i64: 8, 128>}, {pipeline_mode = #tpu.pipeline_mode<synchronous>, transform_indices = @transform_2, window_bounds = array<i64: 1, 128>}, {pipeline_mode = #tpu.pipeline_mode<synchronous>, transform_indices = @transform_3, window_bounds = array<i64: 128, 128>}, {pipeline_mode = #tpu.pipeline_mode<synchronous>, transform_indices = @transform_4, window_bounds = array<i64: 1, 128>}, {pipeline_mode = #tpu.pipeline_mode<synchronous>, transform_indices = @transform_5, window_bounds = array<i64: 128, 128>}, {pipeline_mode = #tpu.pipeline_mode<synchronous>, transform_indices = @transform_6, window_bounds = array<i64: 1, 128>}, {transform_indices = @transform_7, window_bounds = array<i64: 8, 128>}]} {
    %c0 = arith.constant 0 : index
    %c0_0 = arith.constant 0 : index
    %0 = vector.load %arg1[%c0, %c0_0] : memref<8x8xf32, #tpu.memory_space<vmem>>, vector<8x8xf32>
    %c0_1 = arith.constant 0 : index
    %c0_2 = arith.constant 0 : index
    %1 = vector.load %arg2[%c0_1, %c0_2] : memref<8x128xf32, #tpu.memory_space<vmem>>, vector<8x128xf32>
    %cst = arith.constant dense<0.000000e+00> : vector<8x128xf32>
    %2 = tpu.matmul %0, %1, %cst {dimension_numbers = #tpu.dot_dimension_numbers<[1], [0], [0], [1], [0, 0, 1, 1], [], []>} : vector<8x8xf32>, vector<8x128xf32>, vector<8x128xf32> -> vector<8x128xf32>
    %c0_3 = arith.constant 0 : index
    %c0_4 = arith.constant 0 : index
    %3 = vector.load %arg3[%c0_3, %c0_4] : memref<1x128xf32, #tpu.memory_space<vmem>>, vector<1x128xf32>
    %4 = vector.broadcast %3 : vector<1x128xf32> to vector<8x128xf32>
    %5 = arith.addf %2, %4 : vector<8x128xf32>
    %6 = math.tanh %5 : vector<8x128xf32>
    %c0_5 = arith.constant 0 : index
    %c0_6 = arith.constant 0 : index
    %7 = vector.load %arg4[%c0_5, %c0_6] : memref<128x128xf32, #tpu.memory_space<vmem>>, vector<128x128xf32>
    %cst_7 = arith.constant dense<0.000000e+00> : vector<8x128xf32>
    %8 = tpu.matmul %6, %7, %cst_7 {dimension_numbers = #tpu.dot_dimension_numbers<[1], [0], [0], [1], [0, 0, 1, 1], [], []>} : vector<8x128xf32>, vector<128x128xf32>, vector<8x128xf32> -> vector<8x128xf32>
    %c0_8 = arith.constant 0 : index
    %c0_9 = arith.constant 0 : index
    %9 = vector.load %arg5[%c0_8, %c0_9] : memref<1x128xf32, #tpu.memory_space<vmem>>, vector<1x128xf32>
    %10 = vector.broadcast %9 : vector<1x128xf32> to vector<8x128xf32>
    %11 = arith.addf %8, %10 : vector<8x128xf32>
    %cst_10 = arith.constant 0.000000e+00 : f32
    %12 = vector.broadcast %cst_10 : f32 to vector<8x128xf32>
    %13 = arith.maximumf %11, %12 : vector<8x128xf32>
    %c0_11 = arith.constant 0 : index
    %c0_12 = arith.constant 0 : index
    %14 = vector.load %arg6[%c0_11, %c0_12] : memref<128x128xf32, #tpu.memory_space<vmem>>, vector<128x128xf32>
    %cst_13 = arith.constant dense<0.000000e+00> : vector<8x128xf32>
    %15 = tpu.matmul %13, %14, %cst_13 {dimension_numbers = #tpu.dot_dimension_numbers<[1], [0], [0], [1], [0, 0, 1, 1], [], []>} : vector<8x128xf32>, vector<128x128xf32>, vector<8x128xf32> -> vector<8x128xf32>
    %c0_14 = arith.constant 0 : index
    %c0_15 = arith.constant 0 : index
    %16 = vector.load %arg7[%c0_14, %c0_15] : memref<1x128xf32, #tpu.memory_space<vmem>>, vector<1x128xf32>
    %17 = vector.broadcast %16 : vector<1x128xf32> to vector<8x128xf32>
    %18 = arith.addf %15, %17 : vector<8x128xf32>
    %c0_16 = arith.constant 0 : index
    %c0_17 = arith.constant 0 : index
    %19 = vector.load %arg8[%c0_16, %c0_17] : memref<8x128xf32, #tpu.memory_space<vmem>>, vector<8x128xf32>
    tpu.vector_store %arg8[%c0_16, %c0_17], %18 {strides = array<i32>} : memref<8x128xf32, #tpu.memory_space<vmem>>, vector<8x128xf32>,
    return
  }
  func.func @transform_0(%arg0: i32) -> (i32, i32) {
    %c0_i32 = arith.constant 0 : i32
    %c0_i32_0 = arith.constant 0 : i32
    return %arg0, %c0_i32 : i32, i32
  }
  func.func @transform_1(%arg0: i32) -> (i32, i32) {
    %c0_i32 = arith.constant 0 : i32
    %c0_i32_0 = arith.constant 0 : i32
    %c0_i32_1 = arith.constant 0 : i32
    return %c0_i32, %c0_i32_0 : i32, i32
  }
  func.func @transform_2(%arg0: i32) -> (i32, i32) {
    %c0_i32 = arith.constant 0 : i32
    %c0_i32_0 = arith.constant 0 : i32
    %c0_i32_1 = arith.constant 0 : i32
    return %c0_i32, %c0_i32_0 : i32, i32
  }
  func.func @transform_3(%arg0: i32) -> (i32, i32) {
    %c0_i32 = arith.constant 0 : i32
    %c0_i32_0 = arith.constant 0 : i32
    %c0_i32_1 = arith.constant 0 : i32
    return %c0_i32, %c0_i32_0 : i32, i32
  }
  func.func @transform_4(%arg0: i32) -> (i32, i32) {
    %c0_i32 = arith.constant 0 : i32
    %c0_i32_0 = arith.constant 0 : i32
    %c0_i32_1 = arith.constant 0 : i32
    return %c0_i32, %c0_i32_0 : i32, i32
  }
  func.func @transform_5(%arg0: i32) -> (i32, i32) {
    %c0_i32 = arith.constant 0 : i32
    %c0_i32_0 = arith.constant 0 : i32
    %c0_i32_1 = arith.constant 0 : i32
    return %c0_i32, %c0_i32_0 : i32, i32
  }
  func.func @transform_6(%arg0: i32) -> (i32, i32) {
    %c0_i32 = arith.constant 0 : i32
    %c0_i32_0 = arith.constant 0 : i32
    %c0_i32_1 = arith.constant 0 : i32
    return %c0_i32, %c0_i32_0 : i32, i32
  }
  func.func @transform_7(%arg0: i32) -> (i32, i32) {
    %c0_i32 = arith.constant 0 : i32
    %c0_i32_0 = arith.constant 0 : i32
    return %arg0, %c0_i32 : i32, i32
  }
}

</mosaic_0001>

<bundles_post_ra>
// kernel: fused_mlp_forward.1
= control target key start
LH: loop header
LB: loop body
LE: loop exit
PB: predicated region body
PF: predicated region fallthrough
CT: control target
= control target key end

     0   :  { %12 = vsyncpa [#allocation3], 0  ;;  %s660_s0 = inlined_call_operand.vmem [shape: f32[8,8], index: 0, kind: input, shape index: {}]   ;;  %s661_s1 = inlined_call_operand.vmem [shape: f32[8,128], index: 1, kind: input, shape index: {}]   ;;  %s662_s2 = inlined_call_operand.vmem [shape: f32[1,128], index: 2, kind: input, shape index: {}]   ;;  %s663_s3 = inlined_call_operand.hbm [shape: f32[128,128], index: 3, kind: input, shape index: {}]   ;;  %s664_s4 = inlined_call_operand.vmem [shape: f32[1,128], index: 4, kind: input, shape index: {}]   ;;  %s665_s5 = inlined_call_operand.hbm [shape: f32[128,128], index: 5, kind: input, shape index: {}]   ;;  %s666_s6 = inlined_call_operand.vmem [shape: f32[1,128], index: 6, kind: input, shape index: {}]   ;;  %s667_s7 = inlined_call_operand.vmem [shape: f32[8,128], index: 7, kind: output, shape index: {}]  }
   0x1   :  { %13 = vsyncpa [#allocation5], 0  ;;  %s552_s24 = smov [#allocation2]   ;;  %s504_s28 = scalar_lea.hbm %s663_s3, 2048 }
   0x2   :  { %s25_s25 = sshll.u32 %s552_s24, 4  ;;  %p505_p0 = scmp.ne.s32.totalorder %s663_s3, %s504_s28  ;;  %s26_s25 = int_to_ptr.vmem [resolvable:$true] %s25_s25 }
   0x3   :  { %p508_p1 = scmp.lt.u32.totalorder %s504_s28, %s663_s3 }
   0x5   :  { %p510_p2 = pnand %p508_p1, %p505_p0 }
   0x7   :  { %513 = shalt.err (!%p510_p2)
}
   0x8   :  { %s514_s10 = scalar_lea.vmem %s26_s25, 2048  ;;  %p519_p4 = scmp.lt.s32.totalorder %s26_s25, %s26_s25 }
   0x9   :  { %p515_p3 = scmp.ne.s32.totalorder %s26_s25, %s514_s10  ;;  %p520_p5 = scmp.lt.s32.totalorder %s514_s10, %s514_s10 }
   0xb   :  { %p521_p6 = por %p520_p5, %p519_p4 }
   0xd   :  { %p522_p7 = pnand %p521_p6, %p515_p3 }
   0xf   :  { %525 = shalt.err (!%p522_p7)
}
  0x10   :  { %s553_s11 = smov 128   ;;  %s554_s12 = smov 8  }
  0x11   :  { %31 = dma.hbm_to_vmem [thread:$0]  %s663_s3, 2048, %s26_s25, [#allocation3], %s553_s11, %s553_s11, %s554_s12  }
  0x12   :  { %s555_s15 = smov [#allocation4]   ;;  %s526_s19 = scalar_lea.hbm %s665_s5, 2048 }
  0x13   :  { %s39_s16 = sshll.u32 %s555_s15, 4  ;;  %p527_p8 = scmp.ne.s32.totalorder %s665_s5, %s526_s19  ;;  %s40_s16 = int_to_ptr.vmem [resolvable:$true] %s39_s16 }
  0x14   :  { %p530_p9 = scmp.lt.u32.totalorder %s526_s19, %s665_s5 }
  0x16   :  { %p532_p10 = pnand %p530_p9, %p527_p8 }
  0x18   :  { %535 = shalt.err (!%p532_p10)
}
  0x19   :  { %s536_s24 = scalar_lea.vmem %s40_s16, 2048  ;;  %p541_p12 = scmp.lt.s32.totalorder %s40_s16, %s40_s16 }
  0x1a   :  { %p537_p11 = scmp.ne.s32.totalorder %s40_s16, %s536_s24  ;;  %p542_p13 = scmp.lt.s32.totalorder %s536_s24, %s536_s24 }
  0x1c   :  { %p543_p0 = por %p542_p13, %p541_p12 }
  0x1e   :  { %p544_p1 = pnand %p543_p0, %p537_p11 }
  0x20   :  { %547 = shalt.err (!%p544_p1)
}
  0x21   :  { %45 = dma.hbm_to_vmem [thread:$0]  %s665_s5, 2048, %s40_s16, [#allocation5], %s553_s11, %s553_s11, %s554_s12  }
  0x22   :  { %548 = dma.done.wait [#allocation3], 2048  }
  0x23   :  { %549 = vsyncadd [#allocation3], 4294965248 }
  0x24   :  { %550 = dma.done.wait [#allocation5], 2048  }
  0x25   :  { %551 = vsyncadd [#allocation5], 4294965248  ;;  %v556_v0 = vmov 0.0   ;;  %vm557_vm0 = vmmov 0   ;;  %v558_v1 = vmov 0.0|0.0   ;;  %vm63_vm1 = vcmask 64512  }
  0x26   :  { %372 = vmatprep.subr.mxu0 %v556_v0  ;;  %374 = vmatprep.mubr.msk.f32.mxu0 %vm557_vm0, %v556_v0  ;;  %v55_v2 = vld [vmem:[%s661_s1] sm:$0xff]  ;;  %v139_v5 = vld [vmem:[#allocation2 + $0x8] sm:$0xff]  ;;  %v140_v6 = vld [vmem:[#allocation2 + $0x10] sm:$0xff] }
  0x27   :  { %447 = vmatprep.subr.bf16.mxu1 %v558_v1  ;;  %409 = vmatprep.mubr.msk.f32.mxu1 %vm557_vm0, %v556_v0  ;;  %v54_v3 = vld [vmem:[%s660_s0] sm:$0xff]  ;;  %v141_v7 = vld [vmem:[#allocation2 + $0x18] sm:$0xff]  ;;  %v143_v11 = vld [vmem:[#allocation2 + $0x28] sm:$0xff] }
  0x28   :  { %v138_v4 = vld [vmem:[#allocation2] sm:$0xff]  ;;  %373 = vmatpush3.msra.mxu0 %v55_v2  ;;  %v451_v9 = vpack.c.bf16 %v141_v7, %v140_v6  ;;  %v144_v13 = vld [vmem:[#allocation2 + $0x30] sm:$0xff]  ;;  %v145_v14 = vld [vmem:[#allocation2 + $0x38] sm:$0xff] }
  0x29   :  { %375 = vmatmul.mubr.msk.f32.vlgmr.msra.gmra.mrb[0].mxu0 %vm63_vm1, %v54_v3  ;;  %v448_v8 = vpack.c.bf16 %v139_v5, %v138_v4  ;;  %471 = vmatprep.subr.bf16.mxu0 %v558_v1  ;;  %v142_v10 = vld [vmem:[#allocation2 + $0x20] sm:$0xff]  ;;  %v457_v15 = vpack.c.bf16 %v145_v14, %v144_v13  ;;  %v147_v17 = vld [vmem:[#allocation2 + $0x48] sm:$0xff]  ;;  %v148_v19 = vld [vmem:[#allocation2 + $0x50] sm:$0xff] }
  0x2a   :  { %444 = vmatprep.mubr.msk.f32.mxu0 %vm557_vm0, %v556_v0  ;;  %v454_v12 = vpack.c.bf16 %v143_v11, %v142_v10  ;;  %v146_v16 = vld [vmem:[#allocation2 + $0x40] sm:$0xff]  ;;  %v149_v20 = vld [vmem:[#allocation2 + $0x58] sm:$0xff]  ;;  %v151_v23 = vld [vmem:[#allocation2 + $0x68] sm:$0xff] }
  0x2b   :  { %449 = vmatpush3.bf16.msra.mxu1 %v448_v8  ;;  %v460_v18 = vpack.c.bf16 %v147_v17, %v146_v16  ;;  %v463_v21 = vpack.c.bf16 %v149_v20, %v148_v19  ;;  %v150_v22 = vld [vmem:[#allocation2 + $0x60] sm:$0xff]  ;;  %v152_v25 = vld [vmem:[#allocation2 + $0x70] sm:$0xff]  ;;  %v153_v26 = vld [vmem:[#allocation2 + $0x78] sm:$0xff] }
  0x2c   :  { %450 = vmatprep.subr.bf16.mxu1 %v558_v1  ;;  %v466_v24 = vpack.c.bf16 %v151_v23, %v150_v22  ;;  %v469_v27 = vpack.c.bf16 %v153_v26, %v152_v25  ;;  %v232_v28 = vld [vmem:[#allocation4] sm:$0xff]  ;;  %v233_v29 = vld [vmem:[#allocation4 + $0x8] sm:$0xff]  ;;  %v234_v30 = vld [vmem:[#allocation4 + $0x10] sm:$0xff] }
  0x2d   :  { %v472_v31 = vpack.c.bf16 %v233_v29, %v232_v28  ;;  %v235_v32 = vld [vmem:[#allocation4 + $0x18] sm:$0xff]  ;;  %v236_v34 = vld [vmem:[#allocation4 + $0x20] sm:$0xff]  ;;  %v237_v35 = vld [vmem:[#allocation4 + $0x28] sm:$0xff] }
  0x2e   :  { %v475_v33 = vpack.c.bf16 %v235_v32, %v234_v30  ;;  %v478_v36 = vpack.c.bf16 %v237_v35, %v236_v34  ;;  %v238_v37 = vld [vmem:[#allocation4 + $0x30] sm:$0xff]  ;;  %v239_v38 = vld [vmem:[#allocation4 + $0x38] sm:$0xff]  ;;  %v240_v40 = vld [vmem:[#allocation4 + $0x40] sm:$0xff] }
  0x2f   :  { %452 = vmatpush3.bf16.msra.mxu1 %v451_v9  ;;  %473 = vmatpush3.bf16.msra.mxu0 %v472_v31  ;;  %v481_v39 = vpack.c.bf16 %v239_v38, %v238_v37  ;;  %v241_v41 = vld [vmem:[#allocation4 + $0x48] sm:$0xff]  ;;  %v242_v43 = vld [vmem:[#allocation4 + $0x50] sm:$0xff]  ;;  %v243_v44 = vld [vmem:[#allocation4 + $0x58] sm:$0xff] }
  0x30   :  { %453 = vmatprep.subr.bf16.mxu1 %v558_v1  ;;  %474 = vmatprep.subr.bf16.mxu0 %v558_v1  ;;  %v484_v42 = vpack.c.bf16 %v241_v41, %v240_v40  ;;  %v487_v45 = vpack.c.bf16 %v243_v44, %v242_v43  ;;  %v244_v46 = vld [vmem:[#allocation4 + $0x60] sm:$0xff]  ;;  %v245_v47 = vld [vmem:[#allocation4 + $0x68] sm:$0xff]  ;;  %v246_v54 = vld [vmem:[#allocation4 + $0x70] sm:$0xff] }
  0x31   :  { %v490_v48 = vpack.c.bf16 %v245_v47, %v244_v46  ;;  %v332_v49 = vld [vmem:[%s662_s2] ss:$0 sm:$0xff]  ;;  %v247_v55 = vld [vmem:[#allocation4 + $0x78] sm:$0xff] }
  0x32   :  { %v493_v56 = vpack.c.bf16 %v247_v55, %v246_v54  ;;  %v334_v57 = vld [vmem:[%s664_s4] ss:$0 sm:$0xff] }
  0x33   :  { %455 = vmatpush3.bf16.msra.mxu1 %v454_v12  ;;  %476 = vmatpush3.bf16.msra.mxu0 %v475_v33  ;;  %v335_v62 = vld [vmem:[%s666_s6] ss:$0 sm:$0xff] }
  0x34   :  { %456 = vmatprep.subr.bf16.mxu1 %v558_v1  ;;  %477 = vmatprep.subr.bf16.mxu0 %v558_v1 }
  0x37   :  { %458 = vmatpush3.bf16.msra.mxu1 %v457_v15  ;;  %479 = vmatpush3.bf16.msra.mxu0 %v478_v36 }
  0x38   :  { %459 = vmatprep.subr.bf16.mxu1 %v558_v1  ;;  %480 = vmatprep.subr.bf16.mxu0 %v558_v1 }
  0x3b   :  { %461 = vmatpush3.bf16.msra.mxu1 %v460_v18  ;;  %482 = vmatpush3.bf16.msra.mxu0 %v481_v39 }
  0x3c   :  { %462 = vmatprep.subr.bf16.mxu1 %v558_v1  ;;  %483 = vmatprep.subr.bf16.mxu0 %v558_v1 }
  0x3f   :  { %464 = vmatpush3.bf16.msra.mxu1 %v463_v21  ;;  %485 = vmatpush3.bf16.msra.mxu0 %v484_v42 }
  0x40   :  { %465 = vmatprep.subr.bf16.mxu1 %v558_v1  ;;  %486 = vmatprep.subr.bf16.mxu0 %v558_v1 }
  0x43   :  { %467 = vmatpush3.bf16.msra.mxu1 %v466_v24  ;;  %488 = vmatpush3.bf16.msra.mxu0 %v487_v45 }
  0x44   :  { %468 = vmatprep.subr.bf16.mxu1 %v558_v1  ;;  %489 = vmatprep.subr.bf16.mxu0 %v558_v1 }
  0x47   :  { %470 = vmatpush3.bf16.msra.mxu1 %v469_v27  ;;  %491 = vmatpush3.bf16.msra.mxu0 %v490_v48 }
  0x48   :  { %492 = vmatprep.subr.bf16.mxu0 %v558_v1 }
  0x4b   :  { %494 = vmatpush3.bf16.msra.mxu0 %v493_v56 }
  0xfc   :  { %v133_v50 = vpop.f32.mrb[0].mxu0 }
  0xfd   :  { %v134_v51 = vadd.f32 %v332_v49, %v133_v50  ;;  %v376_v52 = vpop.f32.mrb[1].mxu0 }
  0xff   :  { %502 = vtanh.f32 %v134_v51 }
 0x109   :  { %v503_v53 = vpop.eup %502 }
 0x10a   :  { %410 = vmatmul.mubr.f32.vlgmr.msra.gmra.mrb[0].mxu1 %v503_v53 }
 0x1dd   :  { %v227_v58 = vpop.f32.mrb[0].mxu1 }
 0x1de   :  { %v228_v59 = vadd.f32 %v334_v57, %v227_v58  ;;  %v411_v60 = vpop.f32.mrb[1].mxu1 }
 0x1e0   :  { %v231_v61 = vmax.f32 %v228_v59, 0.0 }
 0x1e2   :  { %445 = vmatmul.mubr.f32.vlgmr.msra.gmra.mrb[2].mxu0 %v231_v61 }
 0x2b5   :  { %v321_v63 = vpop.f32.mrb[2].mxu0 }
 0x2b6   :  { %v322_v0 = vadd.f32 %v335_v62, %v321_v63  ;;  %v446_v1 = vpop.f32.mrb[3].mxu0 }
 0x2b8   :  { %325 = vst [vmem:[%s667_s7] sm:$0xff] %v322_v0 }
 0x2b9   :  { %330 = vsyncpa [#allocation3], 1 }
 0x2ba   :  { %331 = vsyncpa [#allocation5], 1 }

</bundles_post_ra>
